<compile_context>
chip_gen: v5e
topology: v5e:2x2
jax: 0.10.0
libtpu: 0.0.40
codegen_flags: <defaults>
</compile_context>

<pallas_src>
import math

import jax
import jax.numpy as jnp
from jax.experimental import pallas as pl
from jax.experimental.pallas import tpu as pltpu


def make_positional_encoding(d_model: int, max_len: int = 5000) -> jnp.ndarray:
    """Deterministic sinusoidal table, identical to the PyTorch __init__."""
    pos = jnp.arange(0, max_len, dtype=jnp.float32)[:, None]            # (max_len, 1)
    div_term = jnp.exp(
        jnp.arange(0, d_model, 2, dtype=jnp.float32) * (-math.log(10000.0) / d_model)
    )
    enc = jnp.zeros((max_len, d_model), dtype=jnp.float32)
    enc = enc.at[:, 0::2].set(jnp.sin(pos * div_term))
    enc = enc.at[:, 1::2].set(jnp.cos(pos * div_term)[:, : d_model // 2])
    return enc                                                           # (max_len, d_model)


def _pe_add_kernel(x_ref, enc_ref, o_ref):
    # Same-shape tiles (row / fold paths) or (1, C) sublane-broadcast add
    # (simple flattened path).  Pure VPU add, minimal bundle.
    o_ref[...] = x_ref[...] + enc_ref[...]


def _round_up(x: int, m: int) -> int:
    return ((x + m - 1) // m) * m


def _round_down(x: int, m: int) -> int:
    return (x // m) * m


def _sublane_multiple(dtype) -> int:
    # Sub-32-bit dtypes pack along sublanes: native tiles are (8,128) f32,
    # (16,128) bf16, (32,128) int8/fp8.
    return max(8, 32 // jnp.dtype(dtype).itemsize)


def _budgets():
    """(per-block byte budget, scoped vmem_limit_bytes), generation-aware."""
    cap = 64 << 20  # conservative default (covers v7x / unknown)
    try:
        cap = int(getattr(pltpu.get_tpu_info(), "vmem_capacity_bytes", cap) or cap)
    except Exception:
        pass
    block_budget = 4 << 20
    # 3 operands x <=2 pipeline buffers x 4 MiB <= 24 MiB of pipeline VMEM.
    # v5e/v6e (128 MiB physical) can comfortably raise the scoped limit;
    # on v7x (64 MiB per TC) stay at the 32 MiB default.
    vmem_limit = (48 << 20) if cap >= (100 << 20) else (32 << 20)
    return block_budget, vmem_limit


def positional_encoding_forward(x: jnp.ndarray, encoding: jnp.ndarray,
                                *, donate_x: bool = False) -> jnp.ndarray:
    """x: (B, S, D); encoding: (max_len, D).  Returns x + encoding[:S]."""
    B, S, D = x.shape
    max_len = encoding.shape[0]
    if S > max_len:
        raise ValueError(f"sequence length {S} exceeds max_len {max_len}")

    itemsize = jnp.dtype(x.dtype).itemsize
    sub = _sublane_multiple(x.dtype)
    block_budget, vmem_limit = _budgets()
    enc_s = encoding[:S, :].astype(x.dtype)                              # (S, D)

    cost = pl.CostEstimate(
        flops=B * S * D,
        bytes_accessed=(2 * B * S + S) * D * itemsize,
        transcendentals=0,
    )
    io_alias = {0: 0} if donate_x else {}

    def _cparams(dims):
        return pltpu.CompilerParams(dimension_semantics=dims,
                                    vmem_limit_bytes=vmem_limit)

    if D % 128 == 0:
        # ---------------- Row path: (B, S, D) with cdiv grid ----------------
        max_rows = max(sub, _round_down(block_budget // (D * itemsize), sub))
        tile_r = min(_round_up(S, sub), max_rows)
        n_s = pl.cdiv(S, tile_r)
        if n_s < 2 and S > sub:
            # Give the "parallel" s axis at least 2 tiles so a v7x 2-TC split
            # does not land on the enc-resident batch axis.
            tile_r = min(tile_r, _round_up(pl.cdiv(S, 2), sub))
            n_s = pl.cdiv(S, tile_r)

        def call(enc_spec):
            return pl.pallas_call(
                _pe_add_kernel,
                out_shape=jax.ShapeDtypeStruct((B, S, D), x.dtype),
                grid=(n_s, B),  # batch innermost -> enc block index repeats
                in_specs=[
                    pl.BlockSpec((pl.Squeezed(), tile_r, D),
                                 lambda s, b: (b, s, 0)),
                    enc_spec,
                ],
                out_specs=pl.BlockSpec((pl.Squeezed(), tile_r, D),
                                       lambda s, b: (b, s, 0)),
                compiler_params=_cparams(("parallel", "arbitrary")),
                cost_estimate=cost,
                input_output_aliases=io_alias,
            )(x, enc_s)

        try:
            # enc's block index only changes once per B inner steps: single-
            # buffer it and spend the VMEM on the x/out tiles instead.
            return call(pl.BlockSpec((tile_r, D), lambda s, b: (s, 0),
                                     pipeline_mode=pl.Buffered(1)))
        except Exception:
            return call(pl.BlockSpec((tile_r, D), lambda s, b: (s, 0)))

    # ---------------- Lane-dense flattened fallback (D % 128 != 0) ----------
    L = S * D

    # Small-B fold: view each batch as (g, L/g) so blocks fill sublanes while
    # keeping enc resident across the (inner) batch axis.
    if B < sub and L % 128 == 0:
        g = 0
        for cand in range(_round_down(S, sub), 0, -sub):
            if S % cand:
                continue
            cols = L // cand
            if cols % 128 or cols < 128:
                continue
            if cand * 128 * itemsize > block_budget:
                continue
            g = cand
            break
        if g:
            cols = L // g
            tile_c = min(cols, max(128, _round_down(block_budget // (g * itemsize), 128)))
            n_c = pl.cdiv(cols, tile_c)
            x2 = x.reshape(B * g, cols)
            enc2 = enc_s.reshape(g, cols)
            out2 = pl.pallas_call(
                _pe_add_kernel,
                out_shape=jax.ShapeDtypeStruct((B * g, cols), x.dtype),
                grid=(n_c, B),  # batch innermost -> enc block index repeats
                in_specs=[
                    pl.BlockSpec((g, tile_c), lambda c, b: (b, c)),
                    pl.BlockSpec((g, tile_c), lambda c, b: (0, c)),
                ],
                out_specs=pl.BlockSpec((g, tile_c), lambda c, b: (b, c)),
                compiler_params=_cparams(("parallel", "arbitrary")),
                cost_estimate=cost,
                input_output_aliases=io_alias,
            )(x2, enc2)
            return out2.reshape(B, S, D)

    # Simple (B, S*D) tiling; batch axis is tiled too so a block never pins
    # the whole slab in VMEM.
    x2 = x.reshape(B, L)
    enc2 = enc_s.reshape(1, L)

    if L % 128 == 0:
        if B <= sub:
            tile_b = B
        else:
            max_b = max(sub, _round_down(block_budget // (128 * itemsize), sub))
            tile_b = max(sub, min(_round_down(B, sub), max_b))
        tile_c = min(L, max(128, _round_down(block_budget // (tile_b * itemsize), 128)))
        n_r = pl.cdiv(B, tile_b)
        n_c = pl.cdiv(L, tile_c)
        grid = (n_c, n_r)  # rows innermost: enc block (depends on c) stays resident
        in_specs = [
            pl.BlockSpec((tile_b, tile_c), lambda c, r: (r, c)),
            pl.BlockSpec((1, tile_c), lambda c, r: (0, c)),
        ]
        out_specs = pl.BlockSpec((tile_b, tile_c), lambda c, r: (r, c))
        dims = ("parallel", "arbitrary")
    else:
        # Last dim not a multiple of 128: the only legal lane block is the full
        # extent; bound VMEM by tiling the batch axis instead (rare shapes).
        rows_fit = max(1, block_budget // (L * itemsize))
        if rows_fit >= B or B <= sub:
            tile_b = B
        else:
            tile_b = max(sub, _round_down(min(rows_fit, B), sub))
        n_r = pl.cdiv(B, tile_b)
        grid = (n_r,)
        in_specs = [
            pl.BlockSpec((tile_b, L), lambda r: (r, 0)),
            pl.BlockSpec((1, L), lambda r: (0, 0)),
        ]
        out_specs = pl.BlockSpec((tile_b, L), lambda r: (r, 0))
        dims = ("parallel",)

    out2 = pl.pallas_call(
        _pe_add_kernel,
        out_shape=jax.ShapeDtypeStruct((B, L), x.dtype),
        grid=grid,
        in_specs=in_specs,
        out_specs=out_specs,
        compiler_params=_cparams(dims),
        cost_estimate=cost,
        input_output_aliases=io_alias,
    )(x2, enc2)
    return out2.reshape(B, S, D)


if __name__ == "__main__":
    # Shapes consistent with the module's forward: x is (batch, seq, d_model).
    # D=32 exercises the lane-dense flattened fallback path.
    B, S, D = 2, 8, 32
    MAX_LEN = 64
    x = jax.random.normal(jax.random.PRNGKey(0), (B, S, D), dtype=jnp.float32)
    encoding = make_positional_encoding(D, max_len=MAX_LEN)

    out = jax.block_until_ready(positional_encoding_forward(x, encoding))
    ref = x + encoding[None, :S, :]
    assert out.shape == x.shape and out.dtype == x.dtype
    assert jnp.allclose(out, ref, atol=1e-6), "mismatch vs reference (fallback path)"

    # Row path with a ragged (non-multiple-of-8) sequence length: exercises the
    # cdiv grid / Squeezed-batch BlockSpec and the enc-resident inner batch axis.
    B2, S2, D2 = 2, 20, 128
    x_big = jax.random.normal(jax.random.PRNGKey(1), (B2, S2, D2), dtype=jnp.float32)
    enc_big = make_positional_encoding(D2, max_len=64)
    out_big = jax.block_until_ready(positional_encoding_forward(x_big, enc_big))
    ref_big = x_big + enc_big[None, :S2, :]
    assert jnp.allclose(out_big, ref_big, atol=1e-6), "mismatch vs reference (row path)"

    print("KERNEL_OK")
</pallas_src>

<mosaic_0001>
module attributes {stable_mosaic.version = 11 : i64} {
  func.func @_pe_add_kernel(%arg0: i32, %arg1: i32, %arg2: memref<2x256xf32, #tpu.memory_space<vmem>>, %arg3: memref<1x256xf32, #tpu.memory_space<vmem>>, %arg4: memref<2x256xf32, #tpu.memory_space<vmem>>) attributes {dimension_semantics = [#tpu.dimension_semantics<parallel>, #tpu.dimension_semantics<arbitrary>], iteration_bounds = array<i64: 1, 1>, scalar_prefetch = 0 : i64, scratch_operands = 0 : i64, tpu.core_type = #tpu.core_type<tc>, window_params = [{transform_indices = @transform_0, window_bounds = array<i64: 2, 256>}, {transform_indices = @transform_1, window_bounds = array<i64: 1, 256>}, {transform_indices = @transform_2, window_bounds = array<i64: 2, 256>}]} {
    %c0 = arith.constant 0 : index
    %c0_0 = arith.constant 0 : index
    %0 = vector.load %arg2[%c0, %c0_0] : memref<2x256xf32, #tpu.memory_space<vmem>>, vector<2x256xf32>
    %c0_1 = arith.constant 0 : index
    %c0_2 = arith.constant 0 : index
    %1 = vector.load %arg3[%c0_1, %c0_2] : memref<1x256xf32, #tpu.memory_space<vmem>>, vector<1x256xf32>
    %2 = vector.broadcast %1 : vector<1x256xf32> to vector<2x256xf32>
    %3 = arith.addf %0, %2 : vector<2x256xf32>
    %c0_3 = arith.constant 0 : index
    %c0_4 = arith.constant 0 : index
    %4 = vector.load %arg4[%c0_3, %c0_4] : memref<2x256xf32, #tpu.memory_space<vmem>>, vector<2x256xf32>
    tpu.vector_store %arg4[%c0_3, %c0_4], %3 {strides = array<i32>} : memref<2x256xf32, #tpu.memory_space<vmem>>, vector<2x256xf32>,
    return
  }
  func.func @transform_0(%arg0: i32, %arg1: i32) -> (i32, i32) {
    %c0_i32 = arith.constant 0 : i32
    return %arg1, %arg0 : i32, i32
  }
  func.func @transform_1(%arg0: i32, %arg1: i32) -> (i32, i32) {
    %c0_i32 = arith.constant 0 : i32
    %c0_i32_0 = arith.constant 0 : i32
    return %c0_i32, %arg0 : i32, i32
  }
  func.func @transform_2(%arg0: i32, %arg1: i32) -> (i32, i32) {
    %c0_i32 = arith.constant 0 : i32
    return %arg1, %arg0 : i32, i32
  }
}

</mosaic_0001>

<bundles_post_ra>
// kernel: tpu_custom_call.1
= control target key start
LH: loop header
LB: loop body
LE: loop exit
PB: predicated region body
PF: predicated region fallthrough
CT: control target
= control target key end

     0   :  { %7 = vsyncpa [#allocation3], 0  ;;  %s177_s0 = inlined_call_operand.hbm [shape: f32[2,256], index: 0, kind: input, shape index: {}]   ;;  %s178_s1 = inlined_call_operand.hbm [shape: f32[1,256], index: 1, kind: input, shape index: {}]   ;;  %s179_s2 = inlined_call_operand.hbm [shape: f32[2,256], index: 2, kind: output, shape index: {}]  }
   0x1   :  { %8 = vsyncpa [#allocation6], 0 }
   0x2   :  { %9 = vsyncpa [#allocation4], 0  ;;  %s15_s11 = sshll.u32 %s177_s0, 4  ;;  %s150_s12 = smov [#allocation2]   ;;  %s16_s11 = int_to_ptr.hbm [resolvable:$true] %s15_s11 }
   0x3   :  { %s17_s13 = sshll.u32 %s150_s12, 4  ;;  %s26_s16 = sshll.u32 %s178_s1, 4  ;;  %s18_s13 = int_to_ptr.vmem [resolvable:$true] %s17_s13  ;;  %s27_s16 = int_to_ptr.hbm [resolvable:$true] %s26_s16 }
   0x4   :  { %20 = dma.hbm_to_vmem [thread:$0]  %s16_s11, 64, %s18_s13, [#allocation3]  }
   0x5   :  { %s151_s17 = smov [#allocation5]  }
   0x6   :  { %s28_s18 = sshll.u32 %s151_s17, 4  ;;  %s29_s18 = int_to_ptr.vmem [resolvable:$true] %s28_s18 }
   0x7   :  { %31 = dma.hbm_to_vmem [thread:$0]  %s27_s16, 32, %s29_s18, [#allocation6]  }
   0x8   :  { %144 = dma.done.wait [#allocation3], 64  }
   0x9   :  { %145 = vsyncadd [#allocation3], 4294967232 }
   0xa   :  { %146 = dma.done.wait [#allocation6], 32  }
   0xb   :  { %147 = vsyncadd [#allocation6], 4294967264  ;;  %v41_v0 = vld [vmem:[#allocation5] sm:$0x3]  ;;  %vm46_vm0 = vcmask 1041408   ;;  %s152_s0 = smov [#allocation7]  }
   0xc   :  { %v43_v1 = vperm.slane %v41_v0, 0  ;;  %v44_v2 = vperm.slane %v41_v0, 1  ;;  %v40_v3 = vld [vmem:[#allocation2] sm:$0xf]  ;;  %s56_s19 = sshll.u32 %s152_s0, 4  ;;  %s58_s21 = sshll.u32 %s179_s2, 4  ;;  %s57_s19 = int_to_ptr.vmem [resolvable:$true] %s56_s19  ;;  %s59_s21 = int_to_ptr.hbm [resolvable:$true] %s58_s21 }
   0xe   :  { %v45_v4 = vrot.slane %v44_v2, 6 }
  0x10   :  { %v47_v5 = vsel %vm46_vm0, %v43_v1, %v45_v4 }
  0x11   :  { %v49_v6 = vadd.f32 %v47_v5, %v40_v3 }
  0x13   :  { %50 = vst [vmem:[#allocation7] sm:$0xf] %v49_v6 }
  0x14   :  { %61 = dma.vmem_to_hbm [thread:$0]  %s57_s19, 64, %s59_s21, [#allocation4]  }
  0x15   :  { %148 = dma.done.wait [#allocation4], 64  }
  0x16   :  { %149 = vsyncadd [#allocation4], 4294967232 }
  0x17   :  { %66 = vsyncpa [#allocation3], 1 }
  0x18   :  { %67 = vsyncpa [#allocation6], 1 }
  0x19   :  { %68 = vsyncpa [#allocation4], 1 }

</bundles_post_ra>
